<compile_context>
chip_gen: v5e
topology: v5e:2x2
jax: 0.10.0
libtpu: 0.0.40
codegen_flags: <defaults>
</compile_context>

<pallas_src>
import functools
import math

import jax
import jax.numpy as jnp
from jax.experimental import pallas as pl
from jax.experimental.pallas import tpu as pltpu


# ----------------------------------------------------------------------------
# helpers
# ----------------------------------------------------------------------------
def _gelu(x):
    # tanh-approximate GELU; tanh maps to the EUP slot (free next to the MXU).
    # TODO(synk): PyTorch nn.GELU()/F.gelu default is the exact erf form; the
    #             tanh approximation differs by <~1e-3.
    c = math.sqrt(2.0 / math.pi)
    return 0.5 * x * (1.0 + jnp.tanh(c * (x + 0.044715 * x * x * x)))


def _pick_tile(total, candidates):
    """Largest candidate tile that evenly divides `total`, else full extent."""
    for c in candidates:
        if total >= c and total % c == 0:
            return c
    return total  # full-extent block is always a legal BlockSpec


_ROW_TILES = (512, 256, 128, 64, 32, 16, 8)      # second-to-last dim (mult. of 8)
_COL_TILES = (512, 256, 128)                     # last / contraction dims (mult. of 128)


def _pad_rows_to_8(x2d):
    """Pad the row axis up to a multiple of 8 so it can always be tiled."""
    T = x2d.shape[0]
    pad = (-T) % 8
    if pad:
        x2d = jnp.pad(x2d, ((0, pad), (0, 0)))
    return x2d, T


# ----------------------------------------------------------------------------
# Pallas kernels
# ----------------------------------------------------------------------------
def _linear_kernel(x_ref, w_ref, b_ref, o_ref, acc_ref, *, activation):
    """One (tm, tn) output tile; K axis (grid dim 2) is the reduction."""
    k = pl.program_id(2)

    @pl.when(k == 0)
    def _():
        acc_ref[...] = jnp.zeros_like(acc_ref)

    acc_ref[...] += jnp.dot(x_ref[...], w_ref[...],
                            preferred_element_type=jnp.float32)

    @pl.when(k == pl.num_programs(2) - 1)
    def _():
        acc = acc_ref[...] + b_ref[...].astype(jnp.float32)
        if activation == "gelu":
            acc = _gelu(acc)
        o_ref[...] = acc.astype(o_ref.dtype)


def _geglu_kernel(x_ref, wa_ref, wg_ref, ba_ref, bg_ref, o_ref,
                  acc_a_ref, acc_g_ref):
    """Fused GEGLU: out = (x@Wa + ba) * gelu(x@Wg + bg), tiled over (T, inner, Din)."""
    k = pl.program_id(2)

    @pl.when(k == 0)
    def _():
        acc_a_ref[...] = jnp.zeros_like(acc_a_ref)
        acc_g_ref[...] = jnp.zeros_like(acc_g_ref)

    x = x_ref[...]
    acc_a_ref[...] += jnp.dot(x, wa_ref[...], preferred_element_type=jnp.float32)
    acc_g_ref[...] += jnp.dot(x, wg_ref[...], preferred_element_type=jnp.float32)

    @pl.when(k == pl.num_programs(2) - 1)
    def _():
        a = acc_a_ref[...] + ba_ref[...].astype(jnp.float32)
        g = acc_g_ref[...] + bg_ref[...].astype(jnp.float32)
        o_ref[...] = (a * _gelu(g)).astype(o_ref.dtype)


# ----------------------------------------------------------------------------
# wrappers
# ----------------------------------------------------------------------------
def pallas_linear(x2d, w, b, activation=None, *, out_dtype=None):
    """x2d: (T, Din), w: (Din, Dout), b: (Dout,).  Tiled + pipelined matmul."""
    out_dtype = x2d.dtype if out_dtype is None else out_dtype
    x2d, T0 = _pad_rows_to_8(x2d)
    T, Din = x2d.shape
    Dout = w.shape[1]

    tm = _pick_tile(T, _ROW_TILES)
    tn = _pick_tile(Dout, _COL_TILES)
    tk = _pick_tile(Din, _COL_TILES)
    grid = (T // tm, Dout // tn, Din // tk)

    kern = functools.partial(_linear_kernel, activation=activation)
    out = pl.pallas_call(
        kern,
        out_shape=jax.ShapeDtypeStruct((T, Dout), out_dtype),
        grid_spec=pltpu.PrefetchScalarGridSpec(
            num_scalar_prefetch=0,
            grid=grid,
            in_specs=[
                pl.BlockSpec((tm, tk), lambda i, j, k: (i, k)),   # x tile
                pl.BlockSpec((tk, tn), lambda i, j, k: (k, j)),   # W tile
                pl.BlockSpec((1, tn), lambda i, j, k: (0, j)),    # bias tile
            ],
            out_specs=pl.BlockSpec((tm, tn), lambda i, j, k: (i, j)),
            scratch_shapes=[pltpu.VMEM((tm, tn), jnp.float32)],
        ),
        compiler_params=pltpu.CompilerParams(
            dimension_semantics=("parallel", "parallel", "arbitrary")),
    )(x2d, w, b.reshape(1, Dout))
    return out[:T0] if T != T0 else out


def pallas_geglu(x2d, w, b, inner_dim, *, out_dtype=None):
    """GEGLU projection.  w: (Din, 2*inner) = [x-half | gate-half], b: (2*inner,)."""
    out_dtype = x2d.dtype if out_dtype is None else out_dtype
    x2d, T0 = _pad_rows_to_8(x2d)
    T, Din = x2d.shape

    tm = _pick_tile(T, _ROW_TILES)
    tn = _pick_tile(inner_dim, _COL_TILES)
    tk = _pick_tile(Din, _COL_TILES)
    grid = (T // tm, inner_dim // tn, Din // tk)
    joff = inner_dim // tn  # block-column offset of the gate half inside w / b

    b2d = b.reshape(1, 2 * inner_dim)
    out = pl.pallas_call(
        _geglu_kernel,
        out_shape=jax.ShapeDtypeStruct((T, inner_dim), out_dtype),
        grid_spec=pltpu.PrefetchScalarGridSpec(
            num_scalar_prefetch=0,
            grid=grid,
            in_specs=[
                pl.BlockSpec((tm, tk), lambda i, j, k: (i, k)),          # x tile
                pl.BlockSpec((tk, tn), lambda i, j, k: (k, j)),          # W, x-half
                pl.BlockSpec((tk, tn), lambda i, j, k: (k, j + joff)),   # W, gate-half
                pl.BlockSpec((1, tn), lambda i, j, k: (0, j)),           # b, x-half
                pl.BlockSpec((1, tn), lambda i, j, k: (0, j + joff)),    # b, gate-half
            ],
            out_specs=pl.BlockSpec((tm, tn), lambda i, j, k: (i, j)),
            scratch_shapes=[pltpu.VMEM((tm, tn), jnp.float32),
                            pltpu.VMEM((tm, tn), jnp.float32)],
        ),
        compiler_params=pltpu.CompilerParams(
            dimension_semantics=("parallel", "parallel", "arbitrary")),
    )(x2d, w, w, b2d, b2d)
    return out[:T0] if T != T0 else out


# ----------------------------------------------------------------------------
# FeedForward module
# ----------------------------------------------------------------------------
class FeedForwardPallas:
    """JAX/Pallas port of FeedForward (inference; Dropout is identity)."""

    def __init__(self, dim, dim_out=None, mult=4, glu=False, dropout=0.0,
                 key=jax.random.PRNGKey(0)):
        inner_dim = int(dim * mult)
        dim_out = dim if dim_out is None else dim_out
        self.dim, self.inner_dim, self.dim_out, self.glu = dim, inner_dim, dim_out, glu
        # TODO(synk): dropout > 0 training-mode masking not implemented (inference path).
        self.dropout = dropout

        k1, k2, k3, k4 = jax.random.split(key, 4)

        def init(kk, fan_in, shape):
            bound = 1.0 / math.sqrt(fan_in)
            return jax.random.uniform(kk, shape, jnp.float32, -bound, bound)

        proj_out = inner_dim * 2 if glu else inner_dim
        # weights stored transposed (in_features, out_features) so y = x @ W.
        self.W1 = init(k1, dim, (dim, proj_out))
        self.b1 = init(k2, dim, (proj_out,))
        self.W2 = init(k3, inner_dim, (inner_dim, dim_out))
        self.b2 = init(k4, inner_dim, (dim_out,))

    def __call__(self, x):
        lead = x.shape[:-1]
        x2d = x.reshape(-1, self.dim)
        if self.glu:
            h = pallas_geglu(x2d, self.W1, self.b1, self.inner_dim)
        else:
            h = pallas_linear(x2d, self.W1, self.b1, activation="gelu")
        # Dropout(p) at inference == identity.
        out = pallas_linear(h, self.W2, self.b2, activation=None)
        return out.reshape(*lead, self.dim_out)


# ----------------------------------------------------------------------------
# pure-JAX reference
# ----------------------------------------------------------------------------
def reference_forward(mod, x):
    hp = jnp.dot(x, mod.W1, precision=jax.lax.Precision.HIGHEST) + mod.b1
    if mod.glu:
        a, g = jnp.split(hp, 2, axis=-1)
        h = a * _gelu(g)
    else:
        h = _gelu(hp)
    return jnp.dot(h, mod.W2, precision=jax.lax.Precision.HIGHEST) + mod.b2


if __name__ == "__main__":
    key = jax.random.PRNGKey(0)
    kx, kp1, kp2 = jax.random.split(key, 3)

    # Small shapes consistent with the module: batch=2, seq=16, dim=32,
    # mult=4 -> inner_dim=128.
    B, N, dim = 2, 16, 32
    x = jax.random.normal(kx, (B, N, dim), jnp.float32)

    # plain GELU path (glu=False, the module default)
    ff = FeedForwardPallas(dim=dim, mult=4, glu=False, dropout=0.0, key=kp1)
    out = jax.block_until_ready(ff(x))
    ref = reference_forward(ff, x)
    assert out.shape == (B, N, dim), out.shape
    assert jnp.allclose(out, ref, atol=1e-3, rtol=1e-3), float(jnp.max(jnp.abs(out - ref)))

    # GEGLU path (glu=True)
    ff_glu = FeedForwardPallas(dim=dim, mult=4, glu=True, dropout=0.0, key=kp2)
    out_glu = jax.block_until_ready(ff_glu(x))
    ref_glu = reference_forward(ff_glu, x)
    assert out_glu.shape == (B, N, dim), out_glu.shape
    assert jnp.allclose(out_glu, ref_glu, atol=1e-3, rtol=1e-3), \
        float(jnp.max(jnp.abs(out_glu - ref_glu)))

    print("KERNEL_OK")
</pallas_src>

<mosaic_0001>
module attributes {stable_mosaic.version = 11 : i64} {
  func.func @_linear_kernel(%arg0: i32, %arg1: i32, %arg2: i32, %arg3: memref<32x32xf32, #tpu.memory_space<vmem>>, %arg4: memref<32x128xf32, #tpu.memory_space<vmem>>, %arg5: memref<1x128xf32, #tpu.memory_space<vmem>>, %arg6: memref<32x128xf32, #tpu.memory_space<vmem>>, %arg7: memref<32x128xf32, #tpu.memory_space<vmem>>) attributes {dimension_semantics = [#tpu.dimension_semantics<parallel>, #tpu.dimension_semantics<parallel>, #tpu.dimension_semantics<arbitrary>], iteration_bounds = array<i64: 1, 1, 1>, scalar_prefetch = 0 : i64, scratch_operands = 1 : i64, tpu.core_type = #tpu.core_type<tc>, window_params = [{transform_indices = @transform_0, window_bounds = array<i64: 32, 32>}, {transform_indices = @transform_1, window_bounds = array<i64: 32, 128>}, {transform_indices = @transform_2, window_bounds = array<i64: 1, 128>}, {transform_indices = @transform_3, window_bounds = array<i64: 32, 128>}]} {
    %c0_i32 = arith.constant 0 : i32
    %0 = arith.cmpi eq, %arg2, %c0_i32 : i32
    %1 = arith.extui %0 : i1 to i32
    %c0_i32_0 = arith.constant 0 : i32
    %2 = arith.cmpi ne, %1, %c0_i32_0 : i32
    scf.if %2 {
      %cst_10 = arith.constant 0.000000e+00 : f32
      %12 = vector.broadcast %cst_10 : f32 to vector<32x128xf32>
      %c0_11 = arith.constant 0 : index
      %c0_12 = arith.constant 0 : index
      %13 = vector.load %arg7[%c0_11, %c0_12] : memref<32x128xf32, #tpu.memory_space<vmem>>, vector<32x128xf32>
      tpu.vector_store %arg7[%c0_11, %c0_12], %12 {strides = array<i32>} : memref<32x128xf32, #tpu.memory_space<vmem>>, vector<32x128xf32>,
    } else {
    }
    %c0 = arith.constant 0 : index
    %c0_1 = arith.constant 0 : index
    %3 = vector.load %arg7[%c0, %c0_1] : memref<32x128xf32, #tpu.memory_space<vmem>>, vector<32x128xf32>
    %c0_2 = arith.constant 0 : index
    %c0_3 = arith.constant 0 : index
    %4 = vector.load %arg3[%c0_2, %c0_3] : memref<32x32xf32, #tpu.memory_space<vmem>>, vector<32x32xf32>
    %c0_4 = arith.constant 0 : index
    %c0_5 = arith.constant 0 : index
    %5 = vector.load %arg4[%c0_4, %c0_5] : memref<32x128xf32, #tpu.memory_space<vmem>>, vector<32x128xf32>
    %cst = arith.constant dense<0.000000e+00> : vector<32x128xf32>
    %6 = tpu.matmul %4, %5, %cst {dimension_numbers = #tpu.dot_dimension_numbers<[1], [0], [0], [1], [0, 0, 1, 1], [], []>} : vector<32x32xf32>, vector<32x128xf32>, vector<32x128xf32> -> vector<32x128xf32>
    %7 = arith.addf %3, %6 : vector<32x128xf32>
    %c0_6 = arith.constant 0 : index
    %c0_7 = arith.constant 0 : index
    %8 = vector.load %arg7[%c0_6, %c0_7] : memref<32x128xf32, #tpu.memory_space<vmem>>, vector<32x128xf32>
    tpu.vector_store %arg7[%c0_6, %c0_7], %7 {strides = array<i32>} : memref<32x128xf32, #tpu.memory_space<vmem>>, vector<32x128xf32>,
    %c0_i32_8 = arith.constant 0 : i32
    %9 = arith.cmpi eq, %arg2, %c0_i32_8 : i32
    %10 = arith.extui %9 : i1 to i32
    %c0_i32_9 = arith.constant 0 : i32
    %11 = arith.cmpi ne, %10, %c0_i32_9 : i32
    scf.if %11 {
      %c0_10 = arith.constant 0 : index
      %c0_11 = arith.constant 0 : index
      %12 = vector.load %arg7[%c0_10, %c0_11] : memref<32x128xf32, #tpu.memory_space<vmem>>, vector<32x128xf32>
      %c0_12 = arith.constant 0 : index
      %c0_13 = arith.constant 0 : index
      %13 = vector.load %arg5[%c0_12, %c0_13] : memref<1x128xf32, #tpu.memory_space<vmem>>, vector<1x128xf32>
      %14 = vector.broadcast %13 : vector<1x128xf32> to vector<32x128xf32>
      %15 = arith.addf %12, %14 : vector<32x128xf32>
      %cst_14 = arith.constant 5.000000e-01 : f32
      %16 = vector.broadcast %cst_14 : f32 to vector<32x128xf32>
      %17 = arith.mulf %16, %15 : vector<32x128xf32>
      %cst_15 = arith.constant 4.471500e-02 : f32
      %18 = vector.broadcast %cst_15 : f32 to vector<32x128xf32>
      %19 = arith.mulf %18, %15 : vector<32x128xf32>
      %20 = arith.mulf %19, %15 : vector<32x128xf32>
      %21 = arith.mulf %20, %15 : vector<32x128xf32>
      %22 = arith.addf %15, %21 : vector<32x128xf32>
      %cst_16 = arith.constant 0.797884583 : f32
      %23 = vector.broadcast %cst_16 : f32 to vector<32x128xf32>
      %24 = arith.mulf %23, %22 : vector<32x128xf32>
      %25 = math.tanh %24 : vector<32x128xf32>
      %cst_17 = arith.constant 1.000000e+00 : f32
      %26 = vector.broadcast %cst_17 : f32 to vector<32x128xf32>
      %27 = arith.addf %26, %25 : vector<32x128xf32>
      %28 = arith.mulf %17, %27 : vector<32x128xf32>
      %c0_18 = arith.constant 0 : index
      %c0_19 = arith.constant 0 : index
      %29 = vector.load %arg6[%c0_18, %c0_19] : memref<32x128xf32, #tpu.memory_space<vmem>>, vector<32x128xf32>
      tpu.vector_store %arg6[%c0_18, %c0_19], %28 {strides = array<i32>} : memref<32x128xf32, #tpu.memory_space<vmem>>, vector<32x128xf32>,
    } else {
    }
    return
  }
  func.func @transform_0(%arg0: i32, %arg1: i32, %arg2: i32) -> (i32, i32) {
    %c0_i32 = arith.constant 0 : i32
    return %arg0, %arg2 : i32, i32
  }
  func.func @transform_1(%arg0: i32, %arg1: i32, %arg2: i32) -> (i32, i32) {
    %c0_i32 = arith.constant 0 : i32
    return %arg2, %arg1 : i32, i32
  }
  func.func @transform_2(%arg0: i32, %arg1: i32, %arg2: i32) -> (i32, i32) {
    %c0_i32 = arith.constant 0 : i32
    %c0_i32_0 = arith.constant 0 : i32
    return %c0_i32, %arg1 : i32, i32
  }
  func.func @transform_3(%arg0: i32, %arg1: i32, %arg2: i32) -> (i32, i32) {
    %c0_i32 = arith.constant 0 : i32
    return %arg0, %arg1 : i32, i32
  }
}

</mosaic_0001>

<bundles_post_ra>
// kernel: tpu_custom_call.1
= control target key start
LH: loop header
LB: loop body
LE: loop exit
PB: predicated region body
PF: predicated region fallthrough
CT: control target
= control target key end

     0   :  { %8 = vsyncpa [#allocation4], 0  ;;  %s346_s0 = inlined_call_operand.hbm [shape: f32[32,32], index: 0, kind: input, shape index: {}]   ;;  %s347_s1 = inlined_call_operand.hbm [shape: f32[32,128], index: 1, kind: input, shape index: {}]   ;;  %s348_s2 = inlined_call_operand.vmem [shape: f32[1,128], index: 2, kind: input, shape index: {}]   ;;  %s349_s3 = inlined_call_operand.hbm [shape: f32[32,128], index: 3, kind: output, shape index: {}]  }
   0x1   :  { %9 = vsyncpa [#allocation7], 0 }
   0x2   :  { %10 = vsyncpa [#allocation5], 0  ;;  %s15_s14 = sshll.u32 %s346_s0, 4  ;;  %s300_s15 = smov [#allocation3]   ;;  %s16_s14 = int_to_ptr.hbm [resolvable:$true] %s15_s14 }
   0x3   :  { %s17_s16 = sshll.u32 %s300_s15, 4  ;;  %s28_s19 = sshll.u32 %s347_s1, 4  ;;  %s18_s16 = int_to_ptr.vmem [resolvable:$true] %s17_s16  ;;  %s29_s19 = int_to_ptr.hbm [resolvable:$true] %s28_s19 }
   0x4   :  { %s301_s20 = smov 128   ;;  %s302_s21 = smov 8  }
   0x5   :  { %23 = dma.hbm_to_vmem [thread:$0]  %s16_s14, 512, %s18_s16, [#allocation4], %s301_s20, %s301_s20, %s302_s21  }
   0x6   :  { %s303_s22 = smov [#allocation6]  }
   0x7   :  { %s30_s23 = sshll.u32 %s303_s22, 4  ;;  %s31_s23 = int_to_ptr.vmem [resolvable:$true] %s30_s23 }
   0x8   :  { %36 = dma.hbm_to_vmem [thread:$0]  %s29_s19, 512, %s31_s23, [#allocation7], %s301_s20, %s301_s20, %s302_s21  }
   0x9   :  { %294 = dma.done.wait [#allocation4], 512  }
   0xa   :  { %295 = vsyncadd [#allocation4], 4294966784 }
   0xb   :  { %296 = dma.done.wait [#allocation7], 512  }
   0xc   :  { %297 = vsyncadd [#allocation7], 4294966784  ;;  %v66_v0 = vld [vmem:[#allocation6 + $0x18] sm:$0xff]  ;;  %v65_v1 = vld [vmem:[#allocation6 + $0x10] sm:$0xff]  ;;  %vm67_vm0 = vcmask 261120   ;;  %s178_s27 = sshll.u32 %s349_s3, 4  ;;  %s179_s27 = int_to_ptr.hbm [resolvable:$true] %s178_s27 }
   0xd   :  { %92 = vmatpush.msra.mxu0 %v66_v0  ;;  %196 = vmatpush.msra.mxu1 %v66_v0  ;;  %v64_v2 = vld [vmem:[#allocation6 + $0x8] sm:$0xff]  ;;  %v63_v3 = vld [vmem:[#allocation6] sm:$0xff]  ;;  %v61_v6 = vld [vmem:[#allocation3 + $0x10] sm:$0xff] }
   0xe   :  { %197 = vmatpush.msra.mxu2 %v66_v0  ;;  %198 = vmatpush.msra.mxu3 %v66_v0  ;;  %v59_v4 = vld [vmem:[#allocation3] sm:$0xff]  ;;  %v60_v5 = vld [vmem:[#allocation3 + $0x8] sm:$0xff]  ;;  %v62_v7 = vld [vmem:[#allocation3 + $0x18] sm:$0xff] }
   0xf   :  { %93 = vmatpush.msra.mxu0 %v65_v1  ;;  %199 = vmatpush.msra.mxu1 %v65_v1  ;;  %v213_v8 = vld [vmem:[%s348_s2] ss:$0 sm:$0xff]  ;;  %s304_s2 = smov [#allocation8]  }
  0x10   :  { %200 = vmatpush.msra.mxu2 %v65_v1  ;;  %201 = vmatpush.msra.mxu3 %v65_v1  ;;  %s176_s24 = sshll.u32 %s304_s2, 4  ;;  %s177_s24 = int_to_ptr.vmem [resolvable:$true] %s176_s24 }
  0x11   :  { %94 = vmatpush.msra.mxu0 %v64_v2  ;;  %202 = vmatpush.msra.mxu1 %v64_v2 }
  0x12   :  { %203 = vmatpush.msra.mxu2 %v64_v2  ;;  %204 = vmatpush.msra.mxu3 %v64_v2 }
  0x13   :  { %95 = vmatpush.msra.mxu0 %v63_v3  ;;  %205 = vmatpush.msra.mxu1 %v63_v3 }
  0x14   :  { %206 = vmatpush.msra.mxu2 %v63_v3  ;;  %207 = vmatpush.msra.mxu3 %v63_v3 }
  0x15   :  { %192 = vmatmul.msk.f32.vlgmr.msra.gmra.mxu0 %vm67_vm0, %v59_v4  ;;  %193 = vmatmul.msk.f32.vlgmr.msra.gmra.mxu1 %vm67_vm0, %v60_v5 }
  0x16   :  { %194 = vmatmul.msk.f32.vlgmr.msra.gmra.mxu2 %vm67_vm0, %v61_v6  ;;  %195 = vmatmul.msk.f32.vlgmr.msra.gmra.mxu3 %vm67_vm0, %v62_v7 }
  0x92   :  { %v97_v9 = vpop.f32.mrf.mxu0  ;;  %v100_v10 = vpop.f32.mrf.mxu1 }
  0x93   :  { %v128_v11 = vadd.f32 %v213_v8, %v97_v9  ;;  %v129_v12 = vadd.f32 %v213_v8, %v100_v10 }
  0x95   :  { %v136_v13 = vmul.f32 0.044715, %v128_v11  ;;  %v137_v14 = vmul.f32 0.044715, %v129_v12  ;;  %v132_v39 = vmul.f32 0.5, %v128_v11  ;;  %v133_v41 = vmul.f32 0.5, %v129_v12 }
  0x97   :  { %v140_v15 = vmul.f32 %v136_v13, %v128_v11  ;;  %v141_v16 = vmul.f32 %v137_v14, %v129_v12 }
  0x99   :  { %v144_v17 = vmul.f32 %v140_v15, %v128_v11  ;;  %v145_v18 = vmul.f32 %v141_v16, %v129_v12  ;;  %v103_v19 = vpop.f32.mrf.mxu2  ;;  %v106_v20 = vpop.f32.mrf.mxu3 }
  0x9a   :  { %v130_v21 = vadd.f32 %v213_v8, %v103_v19  ;;  %v131_v22 = vadd.f32 %v213_v8, %v106_v20 }
  0x9b   :  { %v148_v23 = vadd.f32 %v144_v17, %v128_v11  ;;  %v149_v24 = vadd.f32 %v145_v18, %v129_v12 }
  0x9c   :  { %v138_v25 = vmul.f32 0.044715, %v130_v21  ;;  %v139_v26 = vmul.f32 0.044715, %v131_v22  ;;  %v134_v47 = vmul.f32 0.5, %v130_v21  ;;  %v135_v49 = vmul.f32 0.5, %v131_v22 }
  0x9d   :  { %v152_v27 = vmul.f32 0.7978846, %v148_v23  ;;  %v153_v28 = vmul.f32 0.7978846, %v149_v24 }
  0x9e   :  { %v142_v29 = vmul.f32 %v138_v25, %v130_v21  ;;  %v143_v30 = vmul.f32 %v139_v26, %v131_v22 }
  0x9f   :  { %214 = vtanh.f32 %v152_v27 }
  0xa0   :  { %216 = vtanh.f32 %v153_v28  ;;  %v146_v31 = vmul.f32 %v142_v29, %v130_v21  ;;  %v147_v32 = vmul.f32 %v143_v30, %v131_v22 }
  0xa2   :  { %v150_v33 = vadd.f32 %v146_v31, %v130_v21  ;;  %v151_v34 = vadd.f32 %v147_v32, %v131_v22 }
  0xa4   :  { %v154_v35 = vmul.f32 0.7978846, %v150_v33  ;;  %v155_v36 = vmul.f32 0.7978846, %v151_v34 }
  0xa5   :  { %v215_v37 = vpop.eup %214 }
  0xa6   :  { %v217_v38 = vpop.eup %216  ;;  %218 = vtanh.f32 %v154_v35  ;;  %v160_v40 = vadd.f32 1.0, %v215_v37 }
  0xa7   :  { %220 = vtanh.f32 %v155_v36  ;;  %v161_v42 = vadd.f32 1.0, %v217_v38 }
  0xa8   :  { %v164_v43 = vmul.f32 %v160_v40, %v132_v39 }
  0xa9   :  { %v165_v44 = vmul.f32 %v161_v42, %v133_v41 }
  0xaa   :  { %168 = vst [vmem:[#allocation8] sm:$0xff] %v164_v43 }
  0xab   :  { %169 = vst [vmem:[#allocation8 + $0x8] sm:$0xff] %v165_v44 }
  0xac   :  { %v219_v45 = vpop.eup %218 }
  0xad   :  { %v221_v46 = vpop.eup %220  ;;  %v162_v48 = vadd.f32 1.0, %v219_v45 }
  0xae   :  { %v163_v50 = vadd.f32 1.0, %v221_v46 }
  0xaf   :  { %v166_v51 = vmul.f32 %v162_v48, %v134_v47 }
  0xb0   :  { %v167_v52 = vmul.f32 %v163_v50, %v135_v49 }
  0xb1   :  { %170 = vst [vmem:[#allocation8 + $0x10] sm:$0xff] %v166_v51 }
  0xb2   :  { %171 = vst [vmem:[#allocation8 + $0x18] sm:$0xff] %v167_v52 }
  0xb3   :  { %184 = dma.vmem_to_hbm [thread:$0]  %s177_s24, 512, %s179_s27, [#allocation5], %s301_s20, %s301_s20, %s302_s21  }
  0xb4   :  { %298 = dma.done.wait [#allocation5], 512  }
  0xb5   :  { %299 = vsyncadd [#allocation5], 4294966784 }
  0xb6   :  { %189 = vsyncpa [#allocation4], 1 }
  0xb7   :  { %190 = vsyncpa [#allocation7], 1 }
  0xb8   :  { %191 = vsyncpa [#allocation5], 1 }

</bundles_post_ra>
